<compile_context>
chip_gen: v6e
topology: v6e:2x2x1
jax: 0.10.0
libtpu: 0.0.40
codegen_flags: <defaults>
</compile_context>

<pallas_src>
import functools

import jax
import jax.numpy as jnp
from jax import lax
from jax.experimental import pallas as pl
from jax.experimental.pallas import tpu as pltpu


def _round_up(x, m):
    return ((x + m - 1) // m) * m


def _cdiv(a, b):
    return (a + b - 1) // b


def _tpu_target():
    """Return (mxu_contraction, vmem_capacity_bytes, num_tensorcores)."""
    kind = ""
    try:
        kind = jax.devices()[0].device_kind.lower()
    except Exception:
        pass
    is_v7 = any(t in kind for t in ("v7", "7x", "tpu7"))
    is_v6 = ("v6" in kind) or ("trillium" in kind)
    vmem = None
    try:
        vmem = int(pltpu.get_tpu_info().vmem_capacity_bytes)
    except Exception:
        vmem = None
    if vmem is None:
        vmem = (64 << 20) if is_v7 else (128 << 20)
    mxu_k = 256 if (is_v6 or is_v7) else 128      # v5e: 4x128^2 MXU, v6e/v7x: 2x256^2
    cores = 2 if is_v7 else 1                     # v7x has 2 TensorCores per chip
    return mxu_k, vmem, cores


# --------------------------------------------------------------------------- #
# Kernel bodies
# --------------------------------------------------------------------------- #
def _single_tap_kernel():
    """All taps live in packed-row offset 0: one matmul, no halo, no scratch."""
    def kernel(x_ref, w_ref, b_ref, o_ref):
        acc = jnp.dot(x_ref[0], w_ref[...], preferred_element_type=jnp.float32)
        o_ref[0] = (acc + b_ref[...]).astype(o_ref.dtype)
    return kernel


def _fold_kernel(q_groups, t_blk, c_in_p):
    """im2col into a persistent VMEM scratch (no concats), one MXU matmul."""
    def kernel(x_ref, h_ref, w_ref, b_ref, o_ref, lhs_ref):
        for i, q in enumerate(q_groups):
            col = slice(i * c_in_p, (i + 1) * c_in_p)
            if q == 0:
                lhs_ref[:, col] = x_ref[0]
            elif q < t_blk:
                # In-block rows of the shifted tap ...
                lhs_ref[: t_blk - q, col] = x_ref[0, q:, :]
                # ... plus the few tail rows from the halo block.
                lhs_ref[t_blk - q:, col] = h_ref[0, :q, :]
            else:  # q == t_blk (halo as large as the block)
                lhs_ref[:, col] = h_ref[0, :t_blk, :]
        acc = jnp.dot(lhs_ref[...], w_ref[...], preferred_element_type=jnp.float32)
        o_ref[0] = (acc + b_ref[...]).astype(o_ref.dtype)
    return kernel


def _multi_matmul_kernel(q_offsets, t_blk):
    """Large-C_in path: one aligned window copy, then K full-depth matmuls."""
    def kernel(x_ref, h_ref, w_ref, b_ref, o_ref, win_ref):
        win_ref[:t_blk, :] = x_ref[0]
        win_ref[t_blk:, :] = h_ref[0]
        q0 = q_offsets[0]
        acc = jnp.dot(win_ref[q0:q0 + t_blk, :], w_ref[0],
                      preferred_element_type=jnp.float32)
        for k in range(1, len(q_offsets)):
            q = q_offsets[k]
            acc = acc + jnp.dot(win_ref[q:q + t_blk, :], w_ref[k],
                                preferred_element_type=jnp.float32)
        o_ref[0] = (acc + b_ref[...]).astype(o_ref.dtype)
    return kernel


# --------------------------------------------------------------------------- #
# Wrapper
# --------------------------------------------------------------------------- #
def conv_forward(x, weight, bias=None, *, stride=1, padding=0, dilation=1,
                 t_block=None, compute_dtype=None, force_fold=None):
    """Equivalent of Conv(...).forward(x).

    x:      (B, T, C_in)
    weight: (C_out, C_in, K)   (PyTorch Conv1d layout)
    bias:   (C_out,) or None
    returns (B, T_out, C_out)
    """
    B, T, C_in = x.shape
    C_out, C_in_w, K = weight.shape
    assert C_in_w == C_in
    assert stride >= 1 and dilation >= 1 and padding >= 0

    out_dtype = x.dtype
    cdt = jnp.dtype(compute_dtype) if compute_dtype is not None else jnp.dtype(x.dtype)
    isz = cdt.itemsize
    osz = jnp.dtype(out_dtype).itemsize

    mxu_k, vmem_cap, n_cores = _tpu_target()

    span = dilation * (K - 1) + 1
    T_out = (T + 2 * padding - span) // stride + 1
    assert T_out >= 1, "kernel does not fit in the (padded) input"

    # ---- fold stride into the channel axis ("row packing", free reshape) ------
    # Packed row r holds original rows [r*stride, (r+1)*stride).  Output row t,
    # tap k reads packed row t + q_k at channel offset r_k*C_in, where
    # k*dilation = q_k*stride + r_k.
    C_in_p = stride * C_in
    q_off = [(k * dilation) // stride for k in range(K)]
    r_off = [(k * dilation) % stride for k in range(K)]
    q_groups = sorted(set(q_off))            # taps sharing a packed row share a slot
    nQ = len(q_groups)
    q_max = q_groups[-1]

    # ---- path selection (MXU-aware fold threshold) ----------------------------
    if nQ == 1:
        mode = "single"
    elif force_fold is not None:
        mode = "fold" if force_fold else "nofold"
    elif stride > 1 or C_in < mxu_k:
        mode = "fold"
    else:
        mode = "nofold"
    if mode == "nofold":
        assert stride == 1, "per-tap (no-fold) path assumes stride == 1"

    # ---- output channel layout: pad to 128 lanes only when it is cheap --------
    if C_out % 128 == 0:
        C_out_eff = C_out
    else:
        c_pad = _round_up(C_out, 128)
        C_out_eff = c_pad if c_pad <= 2 * C_out else C_out

    if C_out_eff % 128 == 0 and C_out_eff > 512:
        tn = 512 if C_out_eff % 512 == 0 else (256 if C_out_eff % 256 == 0 else 128)
    else:
        tn = C_out_eff
    nc = C_out_eff // tn

    # ---- sublane alignment (16 rows for 2-byte dtypes, 32 for 1-byte) ---------
    sub = {4: 8, 2: 16, 1: 32}.get(isz, 8)
    halo = _round_up(q_max, sub) if q_max > 0 else 0
    align = halo if halo > 0 else sub

    # ---- weights / bias --------------------------------------------------------
    w_kco = jnp.transpose(weight, (2, 1, 0))                 # (K, C_in, C_out)
    if mode == "nofold":
        w_full = jnp.zeros((K, C_in, C_out_eff), w_kco.dtype)
        w_full = w_full.at[:, :, :C_out].set(w_kco)
        w_op = w_full.astype(cdt)
        w_rows = K * C_in
        w_block_shape = (K, C_in, tn)
        w_index_map = lambda n, b, j: (0, 0, n)
    else:
        # Scatter each tap into its (q-group, r-offset) slot, flatten -> one matmul.
        w_full = jnp.zeros((nQ, C_in_p, C_out_eff), jnp.float32)
        for k in range(K):
            qi = q_groups.index(q_off[k])
            lo = r_off[k] * C_in
            w_full = w_full.at[qi, lo:lo + C_in, :C_out].add(
                w_kco[k].astype(jnp.float32))
        w_op = w_full.reshape(nQ * C_in_p, C_out_eff).astype(cdt)
        w_rows = nQ * C_in_p
        w_block_shape = (nQ * C_in_p, tn)
        w_index_map = lambda n, b, j: (0, n)

    if bias is None:
        b_row = jnp.zeros((1, C_out_eff), jnp.float32)
    else:
        b_row = jnp.zeros((1, C_out_eff), jnp.float32).at[0, :C_out].set(
            bias.astype(jnp.float32))

    # Resident weight: single-buffer when large (constant index_map -> never refetched).
    w_tile_bytes = w_rows * tn * isz
    single_buffer_w = (w_tile_bytes > (2 << 20)) and hasattr(pl, "Buffered")
    wbuf = 1 if single_buffer_w else 2

    # ---- generation-aware VMEM budget & time-tile size -------------------------
    if vmem_cap >= (96 << 20):            # v5e / v6e: 128 MiB physical VMEM
        budget, vmem_limit = 48 << 20, 64 << 20
    else:                                 # v7x: 64 MiB physical VMEM
        budget, vmem_limit = 24 << 20, 40 << 20

    def est_bytes(t):
        bb = 2 * t * C_in_p * isz                         # input block (double buffered)
        if halo:
            bb += 2 * halo * C_in_p * isz                 # halo block
        if mode == "fold":
            bb += t * nQ * C_in_p * isz                   # persistent im2col scratch
        elif mode == "nofold":
            bb += (t + halo) * C_in_p * isz               # persistent window scratch
        bb += wbuf * w_tile_bytes + 2 * tn * 4            # weight + bias
        bb += 2 * t * tn * osz + t * tn * 4               # output blocks + f32 acc
        return bb

    if t_block is None:
        t_blk = min(_round_up(T_out, align), 2048)
        while t_blk > align and est_bytes(t_blk) > budget:
            t_blk = max(align, _round_up(t_blk // 2, align))
        # v7x: make sure both TensorCores get at least one grid step.
        while (n_cores > 1 and t_blk > align
               and B * _cdiv(T_out, t_blk) * nc < n_cores):
            t_blk = max(align, _round_up(t_blk // 2, align))
    else:
        t_blk = _round_up(max(int(t_block), align), align)

    nt = _cdiv(T_out, t_blk)

    # ---- wrapper glue: minimal pad (conv zeros + halo tail), pack the stride ----
    rows_packed = nt * t_blk + halo                        # packed rows the kernel may read
    rows_orig = rows_packed * stride
    pad_back = rows_orig - T - padding
    assert pad_back >= 0
    x_pad = jnp.pad(x.astype(cdt), ((0, 0), (padding, pad_back), (0, 0)))
    x2 = x_pad.reshape(B, rows_packed, C_in_p)             # free contiguous reshape

    # ---- specs ------------------------------------------------------------------
    x_spec = pl.BlockSpec((1, t_blk, C_in_p), lambda n, b, j: (b, j, 0))
    out_spec = pl.BlockSpec((1, t_blk, tn), lambda n, b, j: (b, j, n))
    b_spec = pl.BlockSpec((1, tn), lambda n, b, j: (0, n))
    w_kwargs = {"pipeline_mode": pl.Buffered(1)} if single_buffer_w else {}
    try:
        w_spec = pl.BlockSpec(w_block_shape, w_index_map, **w_kwargs)
    except TypeError:
        w_spec = pl.BlockSpec(w_block_shape, w_index_map)

    operands = [x2]
    in_specs = [x_spec]
    scratch_shapes = []
    if mode == "single":
        kernel = _single_tap_kernel()
    else:
        hpb = t_blk // halo                                # halo blocks per time block
        h_spec = pl.BlockSpec((1, halo, C_in_p),
                              lambda n, b, j: (b, (j + 1) * hpb, 0))
        operands.append(x2)                                # same array, halo view
        in_specs.append(h_spec)
        if mode == "fold":
            kernel = _fold_kernel(tuple(q_groups), t_blk, C_in_p)
            scratch_shapes = [pltpu.VMEM((t_blk, nQ * C_in_p), cdt)]
        else:
            kernel = _multi_matmul_kernel(tuple(q_off), t_blk)
            scratch_shapes = [pltpu.VMEM((t_blk + halo, C_in_p), cdt)]
    operands += [w_op, b_row]
    in_specs += [w_spec, b_spec]

    cost = pl.CostEstimate(
        flops=int(2 * B * T_out * K * C_in * C_out),
        transcendentals=0,
        bytes_accessed=int(B * rows_packed * C_in_p * isz
                           + w_op.size * isz
                           + B * T_out * C_out_eff * osz))

    out = pl.pallas_call(
        kernel,
        out_shape=jax.ShapeDtypeStruct((B, T_out, C_out_eff), out_dtype),
        grid=(nc, B, nt),
        in_specs=in_specs,
        out_specs=out_spec,
        scratch_shapes=scratch_shapes,
        compiler_params=pltpu.CompilerParams(
            dimension_semantics=("parallel", "parallel", "parallel"),
            vmem_limit_bytes=int(vmem_limit)),
        cost_estimate=cost,
    )(*operands)

    if C_out_eff != C_out:
        out = out[:, :, :C_out]
    return out


# --------------------------------------------------------------------------- #
# Pure-JAX reference (identical semantics) and self-test
# --------------------------------------------------------------------------- #
def _reference_conv(x, weight, bias, *, stride=1, padding=0, dilation=1):
    w_t = jnp.transpose(weight, (2, 1, 0))  # (K, C_in, C_out) == 'WIO'
    out = lax.conv_general_dilated(
        x, w_t, window_strides=(stride,), padding=((padding, padding),),
        rhs_dilation=(dilation,), dimension_numbers=("NWC", "WIO", "NWC"))
    if bias is not None:
        out = out + bias[None, None, :]
    return out


if __name__ == "__main__":
    def init(key, B, T, C_in, C_out, K):
        kx, kw, kb = jax.random.split(key, 3)
        x = jax.random.normal(kx, (B, T, C_in), jnp.float32)
        fan_in, fan_out = C_in * K, C_out * K
        limit = (6.0 / (fan_in + fan_out)) ** 0.5
        w = jax.random.uniform(kw, (C_out, C_in, K), jnp.float32, -limit, limit)
        b = jax.random.uniform(kb, (C_out,), jnp.float32, -0.1, 0.1)
        return x, w, b

    def check(out, ref, atol, rtol, name):
        assert out.shape == ref.shape, (name, out.shape, ref.shape)
        err = float(jnp.max(jnp.abs(out - ref)))
        # Tolerances account for the TPU default (bf16-pass) matmul precision of
        # both the kernel and the XLA reference conv; semantic bugs give O(1) errors.
        assert jnp.allclose(out, ref, atol=atol, rtol=rtol), (name, err)

    key = jax.random.PRNGKey(0)
    k1, k2, k3, k4 = jax.random.split(key, 4)

    # 1) Conv(8 -> 16, kernel_size=3, padding=1): fold path, auto time tile.
    x, w, b = init(k1, 2, 40, 8, 16, 3)
    run = jax.jit(functools.partial(conv_forward, stride=1, padding=1, dilation=1))
    out = jax.block_until_ready(run(x, w, b))
    check(out, _reference_conv(x, w, b, stride=1, padding=1, dilation=1),
          2e-2, 2e-2, "k3_pad1")

    # 2) Strided conv (stride folded into channels), several ragged time blocks + halo.
    x, w, b = init(k2, 2, 33, 8, 16, 3)
    run = jax.jit(functools.partial(conv_forward, stride=2, padding=1, dilation=1,
                                    t_block=8))
    out = jax.block_until_ready(run(x, w, b))
    check(out, _reference_conv(x, w, b, stride=2, padding=1, dilation=1),
          2e-2, 2e-2, "stride2")

    # 3) Dilated conv, bf16 MXU inputs (f32 accumulation + f32 bias add).
    x, w, b = init(k3, 2, 40, 8, 16, 3)
    run = jax.jit(functools.partial(conv_forward, stride=1, padding=2, dilation=2,
                                    t_block=16, compute_dtype=jnp.bfloat16))
    out = jax.block_until_ready(run(x, w, b))
    check(out, _reference_conv(x, w, b, stride=1, padding=2, dilation=2),
          1.5e-1, 1e-1, "dilated_bf16")

    # 4) Wide-channel conv exercising the per-tap (no-fold) path, C_out padded to 128.
    x, w, b = init(k4, 2, 32, 128, 64, 3)
    run = jax.jit(functools.partial(conv_forward, stride=1, padding=1, dilation=1,
                                    t_block=16, force_fold=False))
    out = jax.block_until_ready(run(x, w, b))
    check(out, _reference_conv(x, w, b, stride=1, padding=1, dilation=1),
          5e-2, 2e-2, "nofold_cin128")

    # 5) kernel_size=1 (the module default): single-matmul path, no halo.
    x, w, b = init(k1, 2, 40, 8, 16, 1)
    run = jax.jit(conv_forward)
    out = jax.block_until_ready(run(x, w, b))
    check(out, _reference_conv(x, w, b), 2e-2, 2e-2, "k1")

    print("KERNEL_OK")
</pallas_src>

<mosaic_0001>
module attributes {stable_mosaic.version = 11 : i64} {
  func.func @kernel(%arg0: i32, %arg1: i32, %arg2: i32, %arg3: memref<1x40x8xf32, #tpu.memory_space<vmem>>, %arg4: memref<1x8x8xf32, #tpu.memory_space<vmem>>, %arg5: memref<24x16xf32, #tpu.memory_space<vmem>>, %arg6: memref<1x16xf32, #tpu.memory_space<vmem>>, %arg7: memref<1x40x16xf32, #tpu.memory_space<vmem>>, %arg8: memref<40x24xf32, #tpu.memory_space<vmem>>) attributes {dimension_semantics = [#tpu.dimension_semantics<parallel>, #tpu.dimension_semantics<parallel>, #tpu.dimension_semantics<parallel>], iteration_bounds = array<i64: 1, 2, 1>, scalar_prefetch = 0 : i64, scratch_operands = 1 : i64, tpu.core_type = #tpu.core_type<tc>, window_params = [{transform_indices = @transform_0, window_bounds = array<i64: 1, 40, 8>}, {transform_indices = @transform_1, window_bounds = array<i64: 1, 8, 8>}, {transform_indices = @transform_2, window_bounds = array<i64: 24, 16>}, {transform_indices = @transform_3, window_bounds = array<i64: 1, 16>}, {transform_indices = @transform_4, window_bounds = array<i64: 1, 40, 16>}]} {
    %c0 = arith.constant 0 : index
    %c0_0 = arith.constant 0 : index
    %c0_1 = arith.constant 0 : index
    %0 = vector.load %arg3[%c0, %c0_0, %c0_1] : memref<1x40x8xf32, #tpu.memory_space<vmem>>, vector<1x40x8xf32>
    %1 = vector.shape_cast %0 : vector<1x40x8xf32> to vector<40x8xf32>
    %c0_2 = arith.constant 0 : index
    %c0_3 = arith.constant 0 : index
    %2 = vector.load %arg8[%c0_2, %c0_3] : memref<40x24xf32, #tpu.memory_space<vmem>>, vector<40x8xf32>
    tpu.vector_store %arg8[%c0_2, %c0_3], %1 {strides = array<i32>} : memref<40x24xf32, #tpu.memory_space<vmem>>, vector<40x8xf32>,
    %c0_4 = arith.constant 0 : index
    %c1 = arith.constant 1 : index
    %c0_5 = arith.constant 0 : index
    %3 = vector.load %arg3[%c0_4, %c1, %c0_5] : memref<1x40x8xf32, #tpu.memory_space<vmem>>, vector<1x39x8xf32>
    %4 = vector.shape_cast %3 : vector<1x39x8xf32> to vector<39x8xf32>
    %c0_6 = arith.constant 0 : index
    %c8 = arith.constant 8 : index
    %5 = vector.load %arg8[%c0_6, %c8] : memref<40x24xf32, #tpu.memory_space<vmem>>, vector<39x8xf32>
    tpu.vector_store %arg8[%c0_6, %c8], %4 {strides = array<i32>} : memref<40x24xf32, #tpu.memory_space<vmem>>, vector<39x8xf32>,
    %c0_7 = arith.constant 0 : index
    %c0_8 = arith.constant 0 : index
    %c0_9 = arith.constant 0 : index
    %6 = vector.load %arg4[%c0_7, %c0_8, %c0_9] : memref<1x8x8xf32, #tpu.memory_space<vmem>>, vector<1x1x8xf32>
    %7 = vector.shape_cast %6 : vector<1x1x8xf32> to vector<1x8xf32>
    %c39 = arith.constant 39 : index
    %c8_10 = arith.constant 8 : index
    %8 = vector.load %arg8[%c39, %c8_10] : memref<40x24xf32, #tpu.memory_space<vmem>>, vector<1x8xf32>
    tpu.vector_store %arg8[%c39, %c8_10], %7 {strides = array<i32>} : memref<40x24xf32, #tpu.memory_space<vmem>>, vector<1x8xf32>,
    %c0_11 = arith.constant 0 : index
    %c2 = arith.constant 2 : index
    %c0_12 = arith.constant 0 : index
    %9 = vector.load %arg3[%c0_11, %c2, %c0_12] : memref<1x40x8xf32, #tpu.memory_space<vmem>>, vector<1x38x8xf32>
    %10 = vector.shape_cast %9 : vector<1x38x8xf32> to vector<38x8xf32>
    %c0_13 = arith.constant 0 : index
    %c16 = arith.constant 16 : index
    %11 = vector.load %arg8[%c0_13, %c16] : memref<40x24xf32, #tpu.memory_space<vmem>>, vector<38x8xf32>
    tpu.vector_store %arg8[%c0_13, %c16], %10 {strides = array<i32>} : memref<40x24xf32, #tpu.memory_space<vmem>>, vector<38x8xf32>,
    %c0_14 = arith.constant 0 : index
    %c0_15 = arith.constant 0 : index
    %c0_16 = arith.constant 0 : index
    %12 = vector.load %arg4[%c0_14, %c0_15, %c0_16] : memref<1x8x8xf32, #tpu.memory_space<vmem>>, vector<1x2x8xf32>
    %13 = vector.shape_cast %12 : vector<1x2x8xf32> to vector<2x8xf32>
    %c38 = arith.constant 38 : index
    %c16_17 = arith.constant 16 : index
    %14 = vector.load %arg8[%c38, %c16_17] : memref<40x24xf32, #tpu.memory_space<vmem>>, vector<2x8xf32>
    tpu.vector_store %arg8[%c38, %c16_17], %13 {strides = array<i32>} : memref<40x24xf32, #tpu.memory_space<vmem>>, vector<2x8xf32>,
    %c0_18 = arith.constant 0 : index
    %c0_19 = arith.constant 0 : index
    %15 = vector.load %arg8[%c0_18, %c0_19] : memref<40x24xf32, #tpu.memory_space<vmem>>, vector<40x24xf32>
    %c0_20 = arith.constant 0 : index
    %c0_21 = arith.constant 0 : index
    %16 = vector.load %arg5[%c0_20, %c0_21] : memref<24x16xf32, #tpu.memory_space<vmem>>, vector<24x16xf32>
    %cst = arith.constant dense<0.000000e+00> : vector<40x16xf32>
    %17 = tpu.matmul %15, %16, %cst {dimension_numbers = #tpu.dot_dimension_numbers<[1], [0], [0], [1], [0, 0, 1, 1], [], []>} : vector<40x24xf32>, vector<24x16xf32>, vector<40x16xf32> -> vector<40x16xf32>
    %c0_22 = arith.constant 0 : index
    %c0_23 = arith.constant 0 : index
    %18 = vector.load %arg6[%c0_22, %c0_23] : memref<1x16xf32, #tpu.memory_space<vmem>>, vector<1x16xf32>
    %19 = vector.broadcast %18 : vector<1x16xf32> to vector<40x16xf32>
    %20 = arith.addf %17, %19 : vector<40x16xf32>
    %c0_24 = arith.constant 0 : index
    %c0_25 = arith.constant 0 : index
    %c0_26 = arith.constant 0 : index
    %21 = vector.load %arg7[%c0_24, %c0_25, %c0_26] : memref<1x40x16xf32, #tpu.memory_space<vmem>>, vector<1x40x16xf32>
    %22 = vector.shape_cast %21 : vector<1x40x16xf32> to vector<40x16xf32>
    %23 = vector.shape_cast %20 : vector<40x16xf32> to vector<1x40x16xf32>
    tpu.vector_store %arg7[%c0_24, %c0_25, %c0_26], %23 {strides = array<i32>} : memref<1x40x16xf32, #tpu.memory_space<vmem>>, vector<1x40x16xf32>,
    return
  }
  func.func @transform_0(%arg0: i32, %arg1: i32, %arg2: i32) -> (i32, i32, i32) {
    %c0_i32 = arith.constant 0 : i32
    %c0_i32_0 = arith.constant 0 : i32
    return %arg1, %arg2, %c0_i32 : i32, i32, i32
  }
  func.func @transform_1(%arg0: i32, %arg1: i32, %arg2: i32) -> (i32, i32, i32) {
    %c1_i32 = arith.constant 1 : i32
    %0 = arith.addi %arg2, %c1_i32 : i32
    %c5_i32 = arith.constant 5 : i32
    %1 = arith.muli %0, %c5_i32 : i32
    %c0_i32 = arith.constant 0 : i32
    %c0_i32_0 = arith.constant 0 : i32
    return %arg1, %1, %c0_i32 : i32, i32, i32
  }
  func.func @transform_2(%arg0: i32, %arg1: i32, %arg2: i32) -> (i32, i32) {
    %c0_i32 = arith.constant 0 : i32
    %c0_i32_0 = arith.constant 0 : i32
    return %c0_i32, %arg0 : i32, i32
  }
  func.func @transform_3(%arg0: i32, %arg1: i32, %arg2: i32) -> (i32, i32) {
    %c0_i32 = arith.constant 0 : i32
    %c0_i32_0 = arith.constant 0 : i32
    return %c0_i32, %arg0 : i32, i32
  }
  func.func @transform_4(%arg0: i32, %arg1: i32, %arg2: i32) -> (i32, i32, i32) {
    %c0_i32 = arith.constant 0 : i32
    return %arg1, %arg2, %arg0 : i32, i32, i32
  }
}

</mosaic_0001>

<bundles_post_ra>
// kernel: conv_forward.1
= control target key start
LH: loop header
LB: loop body
LE: loop exit
PB: predicated region body
PF: predicated region fallthrough
CT: control target
= control target key end

     0   :  { %s849_s15 = smov 0   ;;  %s851_s16 = smov 0   ;;  %s962_s0 = inlined_call_operand.vmem [shape: f32[2,48,8], index: 0, kind: input, shape index: {}, may-alias: {0,1}]   ;;  %s963_s1 = inlined_call_operand.vmem [shape: f32[2,48,8], index: 1, kind: input, shape index: {}, may-alias: {0,1}]   ;;  %s964_s2 = inlined_call_operand.vmem [shape: f32[24,16], index: 2, kind: input, shape index: {}]   ;;  %s965_s3 = inlined_call_operand.vmem [shape: f32[1,16], index: 3, kind: input, shape index: {}]   ;;  %s966_s4 = inlined_call_operand.vmem [shape: f32[2,40,16], index: 4, kind: output, shape index: {}]  }
   0x1   :  { %s853_s17 = smov 0  }
   0x2 LB: > { %s29_s18 = sadd.s32 1, %s814_s16  ;;  %p715_p0 = scmp.ge.s32.totalorder %s818_s17, 1  ;;  %s818_s17 = sphi %s853_s17, %s14_s17   ;;  %s814_s16 = sphi %s851_s16, %s968_s16   ;;  %s810_s15 = sphi %s849_s15, %s967_s15  }
   0x3   : > { %p31_p1 = scmp.ge.s32.totalorder %s29_s18, 2  ;;  %p240_p2 = scmp.lt.s32.totalorder %s818_s17, 3 }
   0x5   : > { %s970_s18 = smov (%p31_p1, %s29_s18), 0  ;;  %p241_p3 = pnand %p715_p0, %p240_p2 }
   0x6   : > { %p303_p4 = scmp.lt.s32.totalorder (!%p241_p3), %s810_s15, 1  ;;  %s822_s29 = smov (!%p241_p3), 8  }
   0x7   : > { %244 = sbr.rel (%p241_p3) target bundleno = 360 (0x168), region = 36  ;;  %s823_s30 = smov (!%p241_p3), 16  }
   0xc   : > { %v820_v0 = vmov 0.0   ;;  %v444_v1 = vld [vmem:[%s964_s2 + $0x10] sm:$0xff]  ;;  %s972_s15 = smov (!%p303_p4, %s810_s15), 1  ;;  %v443_v2 = vld [vmem:[%s964_s2 + $0x8] sm:$0xff]  ;;  %v442_v3 = vld [vmem:[%s964_s2] sm:$0xff]  ;;  %vm821_vm0 = vmmov 0  }
   0xd   : > { %737 = vmatprep.subr.mxu0 %v820_v0  ;;  %758 = vmatprep.subr.mxu1 %v820_v0  ;;  %s764_s25 = smul.u32 48, %s972_s15  ;;  %vm353_vm1 = vcmask 64512   ;;  %vm384_vm2 = vcmask 130112   ;;  %vm423_vm3 = vcmask 195712   ;;  %vm389_vm4 = vcmask 129088  }
   0xe   : > { %738 = vmatpush3.msra.mxu0 %v444_v1  ;;  %761 = vmatpush3.msra.mxu1 %v444_v1  ;;  %vm452_vm5 = vcmask 195584   ;;  %vm396_vm6 = vcmask 122944   ;;  %vm435_vm7 = vcmask 189568   ;;  %vm428_vm8 = vcmask 193664   ;;  %s766_s9 = smul.u32 40, %s972_s15 }
   0xf   : > { %739 = vmatprep.subr.mxu0 %v820_v0  ;;  %759 = vmatprep.subr.mxu1 %v820_v0  ;;  %s891_s28 = scalar_lea.vmem %s962_s0, %s764_s25  ;;  %s728_s5 = sadd.s32 40, %s764_s25  ;;  %v719_v38 = vld [vmem:[%s965_s3] ss:$0 sm:$0xff]  ;;  %vm558_vm9 = vcmask 130048  }
  0x10   : > { %740 = vmatpush3.msra.mxu0 %v443_v2  ;;  %743 = vmatprep.mubr.msk.f32.mxu0 %vm821_vm0, %v820_v0  ;;  %v360_v4 = vld [vmem:[%s891_s28 + $0x9] sm:$0xff]  ;;  %v359_v5 = vld [vmem:[%s891_s28 + $0x1] sm:$0xff]  ;;  %v362_v6 = vld [vmem:[%s891_s28 + $0x19] sm:$0xff]  ;;  %s325_s8 = scalar_lea.vmem %s963_s1, %s728_s5  ;;  %s346_s14 = scalar_lea.vmem %s966_s4, %s766_s9 }
  0x11   : > { %741 = vmatprep.subr.mxu0 %v820_v0  ;;  %762 = vmatpush3.msra.mxu1 %v443_v2  ;;  %v398_v7 = vld [vmem:[%s891_s28 + $0x2] sm:$0xff]  ;;  %v351_v10 = vld [vmem:[%s891_s28 + $0x18] sm:$0xff]  ;;  %v399_v13 = vld [vmem:[%s891_s28 + $0xa] sm:$0xff] }
  0x12   : > { %742 = vmatpush3.msra.mxu0 %v442_v3  ;;  %760 = vmatprep.subr.mxu1 %v820_v0  ;;  %v349_v8 = vld [vmem:[%s891_s28 + $0x8] sm:$0xff]  ;;  %v348_v9 = vld [vmem:[%s891_s28] sm:$0xff]  ;;  %357 = vst.msk [vmem:[#allocation2 + $0x18] sm:$0xff] %vm353_vm1, %v351_v10  ;;  %v350_v14 = vld [vmem:[%s891_s28 + $0x10] sm:$0xff] }
  0x13   : > { %763 = vmatpush3.msra.mxu1 %v442_v3  ;;  %752 = vmatprep.mubr.msk.f32.mxu1 %vm821_vm0, %v820_v0  ;;  %355 = vst.msk [vmem:[#allocation2 + $0x8] sm:$0xff] %vm353_vm1, %v349_v8  ;;  %354 = vst.msk [vmem:[#allocation2] sm:$0xff] %vm353_vm1, %v348_v9  ;;  %v352_v11 = vld [vmem:[%s891_s28 + $0x20] sm:$0xff]  ;;  %v361_v16 = vld [vmem:[%s891_s28 + $0x11] sm:$0xff] }
  0x14   : > { %371 = vrot.lane.b32.xlu1 %v360_v4, %s822_s29  ;;  %369 = vrot.lane.b32.xlu0 %v359_v5, %s822_s29  ;;  %v401_v12 = vld [vmem:[%s891_s28 + $0x1a] sm:$0xff]  ;;  %358 = vst.msk [vmem:[#allocation2 + $0x20] sm:$0xff] %vm353_vm1, %v352_v11  ;;  %356 = vst.msk [vmem:[#allocation2 + $0x10] sm:$0xff] %vm353_vm1, %v350_v14  ;;  %v400_v17 = vld [vmem:[%s891_s28 + $0x12] sm:$0xff] }
  0x15   : > { %v363_v15 = vld [vmem:[%s891_s28 + $0x21] sm:$0x7f]  ;;  %v391_v18 = vld [vmem:[%s325_s8] sm:$0x1] }
  0x16   : > { %v430_v19 = vld [vmem:[%s325_s8] sm:$0x3]  ;;  %v402_v20 = vld [vmem:[%s891_s28 + $0x22] sm:$0x3f] }
  0x18   : > { %375 = vrot.lane.b32.xlu1 %v362_v6, %s822_s29  ;;  %408 = vrot.lane.b32.xlu0 %v398_v7, %s823_s30 }
  0x1c   : > { %414 = vrot.lane.b32.xlu1 %v401_v12, %s823_s30  ;;  %410 = vrot.lane.b32.xlu0 %v399_v13, %s823_s30 }
  0x20   : > { %377 = vrot.lane.b32.xlu1 %v363_v15, %s822_s29  ;;  %373 = vrot.lane.b32.xlu0 %v361_v16, %s822_s29 }
  0x24   : > { %412 = vrot.lane.b32.xlu1 %v400_v17, %s823_s30  ;;  %393 = vrot.lane.b32.xlu0 %v391_v18, %s822_s29 }
  0x28   : > { %432 = vrot.lane.b32.xlu1 %v430_v19, %s823_s30  ;;  %416 = vrot.lane.b32.xlu0 %v402_v20, %s823_s30 }
  0x86   : > { %v372_v21 = vpop.permute.xlu1 %371  ;;  %v370_v22 = vpop.permute.xlu0 %369 }
  0x87   : > { %386 = vst.msk [vmem:[#allocation2 + $0x8] sm:$0xff] %vm384_vm2, %v372_v21  ;;  %385 = vst.msk [vmem:[#allocation2] sm:$0xff] %vm384_vm2, %v370_v22 }
  0x8a   : > { %v376_v23 = vpop.permute.xlu1 %375  ;;  %v409_v24 = vpop.permute.xlu0 %408 }
  0x8b   : > { %388 = vst.msk [vmem:[#allocation2 + $0x18] sm:$0xff] %vm384_vm2, %v376_v23 }
  0x8c   : > { %424 = vst.msk [vmem:[#allocation2] sm:$0xff] %vm423_vm3, %v409_v24 }
  0x8e   : > { %v415_v25 = vpop.permute.xlu1 %414  ;;  %v411_v26 = vpop.permute.xlu0 %410 }
  0x8f   : > { %427 = vst.msk [vmem:[#allocation2 + $0x18] sm:$0xff] %vm423_vm3, %v415_v25  ;;  %425 = vst.msk [vmem:[#allocation2 + $0x8] sm:$0xff] %vm423_vm3, %v411_v26 }
  0x92   : > { %v378_v27 = vpop.permute.xlu1 %377  ;;  %v374_v28 = vpop.permute.xlu0 %373 }
  0x93   : > { %v437_v29 = vld [vmem:[#allocation2] sm:$0xff]  ;;  %390 = vst.msk [vmem:[#allocation2 + $0x20] sm:$0x7f] %vm389_vm4, %v378_v27 }
  0x94   : > { %387 = vst.msk [vmem:[#allocation2 + $0x10] sm:$0xff] %vm384_vm2, %v374_v28  ;;  %744 = vmatmul.mubr.msk.f32.vlgmr.msra.gmra.mxu0 %vm452_vm5, %v437_v29 }
  0x95   : > { %746 = vmatprep.mubr.msk.f32.mxu0 %vm821_vm0, %v820_v0 }
  0x96   : > { %v413_v30 = vpop.permute.xlu1 %412  ;;  %v394_v31 = vpop.permute.xlu0 %393  ;;  %v438_v32 = vld [vmem:[#allocation2 + $0x8] sm:$0xff]  ;;  %v440_v33 = vld [vmem:[#allocation2 + $0x18] sm:$0xff] }
  0x97   : > { %426 = vst.msk [vmem:[#allocation2 + $0x10] sm:$0xff] %vm423_vm3, %v413_v30  ;;  %753 = vmatmul.mubr.msk.f32.vlgmr.msra.gmra.mxu1 %vm452_vm5, %v440_v33 }
  0x98   : > { %397 = vst.msk [vmem:[#allocation2 + $0x27] sm:$0x1] %vm396_vm6, %v394_v31  ;;  %747 = vmatmul.mubr.msk.f32.gmra.mxu0 %vm452_vm5, %v438_v32  ;;  %755 = vmatprep.mubr.msk.f32.mxu1 %vm821_vm0, %v820_v0 }
  0x99   : > { %749 = vmatprep.mubr.msk.f32.mxu0 %vm821_vm0, %v820_v0 }
  0x9a   : > { %v433_v34 = vpop.permute.xlu1 %432  ;;  %v417_v35 = vpop.permute.xlu0 %416 }
  0x9b   : > { %436 = vst.msk [vmem:[#allocation2 + $0x26] sm:$0x3] %vm435_vm7, %v433_v34 }
  0x9c   : > { %429 = vst.msk [vmem:[#allocation2 + $0x20] sm:$0x3f] %vm428_vm8, %v417_v35 }
  0x9e   : > { %v439_v36 = vld [vmem:[#allocation2 + $0x10] sm:$0xff] }
  0x9f   : > { %750 = vmatmul.mubr.msk.f32.gmra.mxu0 %vm452_vm5, %v439_v36 }
  0xa3   : > { %v441_v37 = vld [vmem:[#allocation2 + $0x20] sm:$0xff] }
  0xa4   : > { %756 = vmatmul.mubr.msk.f32.gmra.mxu1 %vm452_vm5, %v441_v37 }
 0x154   : > { %v534_v39 = vpop.f32.mrf.mxu0 }
 0x155   : > { %v535_v40 = vadd.f32 %v719_v38, %v534_v39 }
 0x156   : > { %v745_v41 = vpop.f32.mrf.mxu0 }
 0x157   : > { %559 = vst.msk [vmem:[%s346_s14] sm:$0xff] %vm558_vm9, %v535_v40  ;;  %v549_v43 = vpop.f32.mrf.mxu1 }
 0x158   : > { %v539_v42 = vpop.f32.mrf.mxu0  ;;  %v550_v45 = vadd.f32 %v719_v38, %v549_v43 }
 0x159   : > { %v540_v44 = vadd.f32 %v719_v38, %v539_v42  ;;  %v754_v47 = vpop.f32.mrf.mxu1 }
 0x15a   : > { %v748_v46 = vpop.f32.mrf.mxu0  ;;  %562 = vst.msk [vmem:[%s346_s14 + $0x18] sm:$0xff] %vm558_vm9, %v550_v45 }
 0x15b   : > { %560 = vst.msk [vmem:[%s346_s14 + $0x8] sm:$0xff] %vm558_vm9, %v540_v44 }
 0x15f   : > { %v544_v48 = vpop.f32.mrf.mxu0 }
 0x160   : > { %v545_v49 = vadd.f32 %v719_v38, %v544_v48 }
 0x161   : > { %v751_v50 = vpop.f32.mrf.mxu0 }
 0x162   : > { %561 = vst.msk [vmem:[%s346_s14 + $0x10] sm:$0xff] %vm558_vm9, %v545_v49 }
 0x164   : > { %v554_v51 = vpop.f32.mrf.mxu1 }
 0x165   : > { %v555_v52 = vadd.f32 %v719_v38, %v554_v51 }
 0x166   : > { %v757_v53 = vpop.f32.mrf.mxu1 }
 0x167   : > { %563 = vst.msk [vmem:[%s346_s14 + $0x20] sm:$0xff] %vm558_vm9, %v555_v52 }
 0x168 PF: > { %s14_s17 = sadd.s32 1, %s818_s17   ;;  %s967_s15 = smov %s814_s16 }
 0x169   : > { %p11_p5 = scmp.ge.s32.totalorder %s14_s17, 4   ;;  %s968_s16 = smov %s970_s18 }
 0x16b   :  { %13 = sbr.rel (!%p11_p5) target bundleno = 2 (0x2), region = 75 }

</bundles_post_ra>
